<compile_context>
chip_gen: v7x
topology: tpu7x:2x2x1
jax: 0.10.0
libtpu: 0.0.40
codegen_flags: <defaults>
</compile_context>

<pallas_src>
import functools

import jax
import jax.numpy as jnp
from jax.experimental import pallas as pl
from jax.experimental.pallas import tpu as pltpu

OUT_W = 128   # packed output width: col 0 = log_prob, col 1 = value, col 2 = entropy
L3_W = 128    # fused layer-3 width: cols [0,A) = logits, col A = value, rest zero-pad


def actor_critic_kernel(x_ref, act_ref,
                        w1_ref, b1_ref, w2_ref, b2_ref, w3_ref, b3_ref,
                        out_ref, *, action_dim):
    x = x_ref[...]                                                  # (TB, S) f32

    # ----- fused actor||critic MLP: 3 matmuls (bf16 operands, f32 accumulate) -----
    h = jnp.dot(x.astype(jnp.bfloat16), w1_ref[...],
                preferred_element_type=jnp.float32) + b1_ref[...]   # (TB, 2H)
    h = jnp.maximum(h, 0.0)

    h = jnp.dot(h.astype(jnp.bfloat16), w2_ref[...],
                preferred_element_type=jnp.float32) + b2_ref[...]   # (TB, 2H)
    h = jnp.maximum(h, 0.0)

    y = jnp.dot(h.astype(jnp.bfloat16), w3_ref[...],
                preferred_element_type=jnp.float32) + b3_ref[...]   # (TB, L3_W)

    logits = y[:, :action_dim]                                      # (TB, A)
    value = y[:, action_dim:action_dim + 1]                         # (TB, 1)

    # ----- stable softmax / log-softmax, Categorical log_prob + entropy (f32) -----
    m = jnp.max(logits, axis=-1, keepdims=True)
    z = logits - m
    ez = jnp.exp(z)
    sez = jnp.sum(ez, axis=-1, keepdims=True)                       # >= 1, safe
    lse = jnp.log(sez)
    log_probs = z - lse
    probs = ez * pl.reciprocal(sez, approx=True)

    tb = logits.shape[0]
    col = jax.lax.broadcasted_iota(jnp.int32, (tb, action_dim), 1)
    one_hot = (col == act_ref[...]).astype(jnp.float32)             # act: (TB,1) int32
    logp = jnp.sum(one_hot * log_probs, axis=-1, keepdims=True)     # (TB, 1)
    ent = -jnp.sum(probs * log_probs, axis=-1, keepdims=True)       # (TB, 1)

    # ----- pack (logp | value | entropy) into one lane-dense output tile -----
    lane = jax.lax.broadcasted_iota(jnp.int32, (tb, OUT_W), 1)
    out_ref[...] = (jnp.where(lane == 0, logp, 0.0)
                    + jnp.where(lane == 1, value, 0.0)
                    + jnp.where(lane == 2, ent, 0.0))


def fuse_params(params, action_dim):
    """Build fused (actor||critic) weights once; bf16 for MXU operands, f32 biases."""
    (aw1, ab1, aw2, ab2, aw3, ab3, cw1, cb1, cw2, cb2, cw3, cb3) = params
    S, H = aw1.shape
    assert action_dim + 2 <= min(L3_W, OUT_W)

    w1 = jnp.concatenate([aw1, cw1], axis=1)                        # (S, 2H)
    b1 = jnp.concatenate([ab1, cb1], axis=1)                        # (1, 2H)

    w2 = jnp.zeros((2 * H, 2 * H), jnp.float32)
    w2 = w2.at[:H, :H].set(aw2).at[H:, H:].set(cw2)                 # block-diag
    b2 = jnp.concatenate([ab2, cb2], axis=1)

    w3 = jnp.zeros((2 * H, L3_W), jnp.float32)
    w3 = w3.at[:H, :action_dim].set(aw3)
    w3 = w3.at[H:, action_dim:action_dim + 1].set(cw3)              # block-diag, lane-padded
    b3 = jnp.zeros((1, L3_W), jnp.float32)
    b3 = b3.at[:, :action_dim].set(ab3)
    b3 = b3.at[:, action_dim:action_dim + 1].set(cb3)

    return (w1.astype(jnp.bfloat16), b1,
            w2.astype(jnp.bfloat16), b2,
            w3.astype(jnp.bfloat16), b3)


def actor_critic_evaluate(state, action, fused_params, action_dim, batch_tile=256):
    """Pallas equivalent of ActorCritic.evaluate(state, action).

    Returns (action_logprobs [B], state_values [B], dist_entropy [B])."""
    B, S = state.shape
    w1, b1, w2, b2, w3, b3 = fused_params
    H2 = w1.shape[1]

    # Batch tile: cap at batch_tile, keep sublane-aligned; pad batch to a multiple.
    tb = min(batch_tile, max(8, ((B + 7) // 8) * 8))
    Bp = pl.cdiv(B, tb) * tb
    pad = Bp - B
    if pad:
        state = jnp.pad(state, ((0, pad), (0, 0)))
        action = jnp.pad(action, ((0, pad),))
    act2d = action.astype(jnp.int32).reshape(Bp, 1)

    grid = (Bp // tb,)
    flops = 2 * Bp * (S * H2 + H2 * H2 + H2 * L3_W)
    bytes_accessed = (Bp * S * 4 + Bp * 4 + Bp * OUT_W * 4
                      + 2 * (w1.size + w2.size + w3.size)
                      + 4 * (b1.size + b2.size + b3.size))

    kernel = functools.partial(actor_critic_kernel, action_dim=action_dim)

    packed = pl.pallas_call(
        kernel,
        grid=grid,
        out_shape=jax.ShapeDtypeStruct((Bp, OUT_W), jnp.float32),
        in_specs=[
            pl.BlockSpec((tb, S), lambda i: (i, 0)),       # state tile (pipelined)
            pl.BlockSpec((tb, 1), lambda i: (i, 0)),       # action tile
            pl.BlockSpec(w1.shape, lambda i: (0, 0)),      # fused weights: VMEM-resident
            pl.BlockSpec(b1.shape, lambda i: (0, 0)),
            pl.BlockSpec(w2.shape, lambda i: (0, 0)),
            pl.BlockSpec(b2.shape, lambda i: (0, 0)),
            pl.BlockSpec(w3.shape, lambda i: (0, 0)),
            pl.BlockSpec(b3.shape, lambda i: (0, 0)),
        ],
        out_specs=pl.BlockSpec((tb, OUT_W), lambda i: (i, 0)),
        compiler_params=pltpu.CompilerParams(
            dimension_semantics=("parallel",),             # v7x: shard batch over 2 TCs
            vmem_limit_bytes=32 * 1024 * 1024),
        cost_estimate=pl.CostEstimate(
            flops=flops,
            transcendentals=Bp * (action_dim + 2),
            bytes_accessed=bytes_accessed),
    )(state, act2d, w1, b1, w2, b2, w3, b3)

    return packed[:B, 0], packed[:B, 1], packed[:B, 2]


def init_params(key, state_dim, action_dim, hidden=256):
    """Deterministic synthetic weights (actor + critic), layout [in, out]."""
    ks = jax.random.split(key, 12)

    def lin(kw, kb, fan_in, fan_out):
        bound = 1.0 / jnp.sqrt(jnp.float32(fan_in))
        w = jax.random.uniform(kw, (fan_in, fan_out), jnp.float32, -bound, bound)
        b = jax.random.uniform(kb, (1, fan_out), jnp.float32, -bound, bound)
        return w, b

    aw1, ab1 = lin(ks[0], ks[1], state_dim, hidden)
    aw2, ab2 = lin(ks[2], ks[3], hidden, hidden)
    aw3, ab3 = lin(ks[4], ks[5], hidden, action_dim)
    cw1, cb1 = lin(ks[6], ks[7], state_dim, hidden)
    cw2, cb2 = lin(ks[8], ks[9], hidden, hidden)
    cw3, cb3 = lin(ks[10], ks[11], hidden, 1)
    return (aw1, ab1, aw2, ab2, aw3, ab3, cw1, cb1, cw2, cb2, cw3, cb3)


def reference_evaluate(state, action, params):
    """Pure-JAX f32 reference of ActorCritic.evaluate (unfused weights)."""
    (aw1, ab1, aw2, ab2, aw3, ab3, cw1, cb1, cw2, cb2, cw3, cb3) = params
    h = jnp.maximum(state @ aw1 + ab1, 0.0)
    h = jnp.maximum(h @ aw2 + ab2, 0.0)
    logits = h @ aw3 + ab3
    log_probs = jax.nn.log_softmax(logits, axis=-1)
    probs = jnp.exp(log_probs)
    logp = jnp.take_along_axis(log_probs, action.astype(jnp.int32)[:, None], axis=-1)[:, 0]
    ent = -jnp.sum(probs * log_probs, axis=-1)
    c = jnp.maximum(state @ cw1 + cb1, 0.0)
    c = jnp.maximum(c @ cw2 + cb2, 0.0)
    val = (c @ cw3 + cb3)[:, 0]
    return logp, val, ent


if __name__ == "__main__":
    STATE_DIM, ACTION_DIM = 32, 8

    key = jax.random.PRNGKey(0)
    k_params, k_data = jax.random.split(key)

    params = init_params(k_params, STATE_DIM, ACTION_DIM)
    fused = fuse_params(params, ACTION_DIM)

    # B=8: single tile; B=300: exercises batch padding + multi-step grid (TB=256, grid=2).
    for B in (8, 300):
        ks, ka = jax.random.split(jax.random.fold_in(k_data, B))
        state = jax.random.normal(ks, (B, STATE_DIM), jnp.float32)
        action = jax.random.randint(ka, (B,), 0, ACTION_DIM, jnp.int32)

        logp, val, ent = actor_critic_evaluate(state, action, fused, ACTION_DIM)
        jax.block_until_ready((logp, val, ent))

        logp_r, val_r, ent_r = reference_evaluate(state, action, params)
        # bf16 MXU operands vs f32 reference -> relaxed tolerance (expected, not a bug).
        assert jnp.allclose(logp, logp_r, atol=5e-2, rtol=5e-2), f"log_prob mismatch (B={B})"
        assert jnp.allclose(val, val_r, atol=5e-2, rtol=5e-2), f"value mismatch (B={B})"
        assert jnp.allclose(ent, ent_r, atol=5e-2, rtol=5e-2), f"entropy mismatch (B={B})"

    print("KERNEL_OK")
</pallas_src>

<mosaic_0001>
module attributes {stable_mosaic.version = 11 : i64} {
  func.func @actor_critic_kernel(%arg0: i32, %arg1: memref<8x32xf32, #tpu.memory_space<vmem>>, %arg2: memref<8x1xi32, #tpu.memory_space<vmem>>, %arg3: memref<32x512xbf16, #tpu.memory_space<vmem>>, %arg4: memref<1x512xf32, #tpu.memory_space<vmem>>, %arg5: memref<512x512xbf16, #tpu.memory_space<vmem>>, %arg6: memref<1x512xf32, #tpu.memory_space<vmem>>, %arg7: memref<512x128xbf16, #tpu.memory_space<vmem>>, %arg8: memref<1x128xf32, #tpu.memory_space<vmem>>, %arg9: memref<8x128xf32, #tpu.memory_space<vmem>>) attributes {dimension_semantics = [#tpu.dimension_semantics<parallel>], iteration_bounds = array<i64: 1>, scalar_prefetch = 0 : i64, scratch_operands = 0 : i64, tpu.core_type = #tpu.core_type<tc>, window_params = [{transform_indices = @transform_0, window_bounds = array<i64: 8, 32>}, {transform_indices = @transform_1, window_bounds = array<i64: 8, 1>}, {pipeline_mode = #tpu.pipeline_mode<synchronous>, transform_indices = @transform_2, window_bounds = array<i64: 32, 512>}, {pipeline_mode = #tpu.pipeline_mode<synchronous>, transform_indices = @transform_3, window_bounds = array<i64: 1, 512>}, {pipeline_mode = #tpu.pipeline_mode<synchronous>, transform_indices = @transform_4, window_bounds = array<i64: 512, 512>}, {pipeline_mode = #tpu.pipeline_mode<synchronous>, transform_indices = @transform_5, window_bounds = array<i64: 1, 512>}, {pipeline_mode = #tpu.pipeline_mode<synchronous>, transform_indices = @transform_6, window_bounds = array<i64: 512, 128>}, {pipeline_mode = #tpu.pipeline_mode<synchronous>, transform_indices = @transform_7, window_bounds = array<i64: 1, 128>}, {transform_indices = @transform_8, window_bounds = array<i64: 8, 128>}]} {
    %c0 = arith.constant 0 : index
    %c0_0 = arith.constant 0 : index
    %0 = vector.load %arg1[%c0, %c0_0] : memref<8x32xf32, #tpu.memory_space<vmem>>, vector<8x32xf32>
    %1 = arith.truncf %0 : vector<8x32xf32> to vector<8x32xbf16>
    %c0_1 = arith.constant 0 : index
    %c0_2 = arith.constant 0 : index
    %2 = vector.load %arg3[%c0_1, %c0_2] : memref<32x512xbf16, #tpu.memory_space<vmem>>, vector<32x512xbf16>
    %cst = arith.constant dense<0.000000e+00> : vector<8x512xf32>
    %3 = tpu.matmul %1, %2, %cst {dimension_numbers = #tpu.dot_dimension_numbers<[1], [0], [0], [1], [0, 0, 1, 1], [], []>} : vector<8x32xbf16>, vector<32x512xbf16>, vector<8x512xf32> -> vector<8x512xf32>
    %c0_3 = arith.constant 0 : index
    %c0_4 = arith.constant 0 : index
    %4 = vector.load %arg4[%c0_3, %c0_4] : memref<1x512xf32, #tpu.memory_space<vmem>>, vector<1x512xf32>
    %5 = vector.broadcast %4 : vector<1x512xf32> to vector<8x512xf32>
    %6 = arith.addf %3, %5 : vector<8x512xf32>
    %cst_5 = arith.constant 0.000000e+00 : f32
    %7 = vector.broadcast %cst_5 : f32 to vector<8x512xf32>
    %8 = arith.maximumf %6, %7 : vector<8x512xf32>
    %9 = arith.truncf %8 : vector<8x512xf32> to vector<8x512xbf16>
    %c0_6 = arith.constant 0 : index
    %c0_7 = arith.constant 0 : index
    %10 = vector.load %arg5[%c0_6, %c0_7] : memref<512x512xbf16, #tpu.memory_space<vmem>>, vector<512x512xbf16>
    %cst_8 = arith.constant dense<0.000000e+00> : vector<8x512xf32>
    %11 = tpu.matmul %9, %10, %cst_8 {dimension_numbers = #tpu.dot_dimension_numbers<[1], [0], [0], [1], [0, 0, 1, 1], [], []>} : vector<8x512xbf16>, vector<512x512xbf16>, vector<8x512xf32> -> vector<8x512xf32>
    %c0_9 = arith.constant 0 : index
    %c0_10 = arith.constant 0 : index
    %12 = vector.load %arg6[%c0_9, %c0_10] : memref<1x512xf32, #tpu.memory_space<vmem>>, vector<1x512xf32>
    %13 = vector.broadcast %12 : vector<1x512xf32> to vector<8x512xf32>
    %14 = arith.addf %11, %13 : vector<8x512xf32>
    %cst_11 = arith.constant 0.000000e+00 : f32
    %15 = vector.broadcast %cst_11 : f32 to vector<8x512xf32>
    %16 = arith.maximumf %14, %15 : vector<8x512xf32>
    %17 = arith.truncf %16 : vector<8x512xf32> to vector<8x512xbf16>
    %c0_12 = arith.constant 0 : index
    %c0_13 = arith.constant 0 : index
    %18 = vector.load %arg7[%c0_12, %c0_13] : memref<512x128xbf16, #tpu.memory_space<vmem>>, vector<512x128xbf16>
    %cst_14 = arith.constant dense<0.000000e+00> : vector<8x128xf32>
    %19 = tpu.matmul %17, %18, %cst_14 {dimension_numbers = #tpu.dot_dimension_numbers<[1], [0], [0], [1], [0, 0, 1, 1], [], []>} : vector<8x512xbf16>, vector<512x128xbf16>, vector<8x128xf32> -> vector<8x128xf32>
    %c0_15 = arith.constant 0 : index
    %c0_16 = arith.constant 0 : index
    %20 = vector.load %arg8[%c0_15, %c0_16] : memref<1x128xf32, #tpu.memory_space<vmem>>, vector<1x128xf32>
    %21 = vector.broadcast %20 : vector<1x128xf32> to vector<8x128xf32>
    %22 = arith.addf %19, %21 : vector<8x128xf32>
    %23 = vector.extract_strided_slice %22 {offsets = [0, 0], sizes = [8, 8], strides = [1, 1]} : vector<8x128xf32> to vector<8x8xf32>
    %24 = vector.extract_strided_slice %22 {offsets = [0, 8], sizes = [8, 1], strides = [1, 1]} : vector<8x128xf32> to vector<8x1xf32>
    %cst_17 = arith.constant dense<0xFF800000> : vector<8xf32>
    %25 = vector.multi_reduction <maximumf>, %23, %cst_17 [1] : vector<8x8xf32> to vector<8xf32>
    %26 = vector.shape_cast %25 : vector<8xf32> to vector<8x1xf32>
    %27 = vector.broadcast %26 : vector<8x1xf32> to vector<8x8xf32>
    %28 = arith.subf %23, %27 : vector<8x8xf32>
    %29 = math.exp %28 : vector<8x8xf32>
    %cst_18 = arith.constant dense<0.000000e+00> : vector<8xf32>
    %30 = vector.multi_reduction <add>, %29, %cst_18 [1] : vector<8x8xf32> to vector<8xf32>
    %31 = vector.shape_cast %30 : vector<8xf32> to vector<8x1xf32>
    %32 = math.log %31 : vector<8x1xf32>
    %33 = vector.broadcast %32 : vector<8x1xf32> to vector<8x8xf32>
    %34 = arith.subf %28, %33 : vector<8x8xf32>
    %35 = tpu.reciprocal %31 {approx = true} : vector<8x1xf32> -> vector<8x1xf32>
    %36 = vector.broadcast %35 : vector<8x1xf32> to vector<8x8xf32>
    %37 = arith.mulf %29, %36 : vector<8x8xf32>
    %38 = tpu.iota {dimensions = array<i32: 1>} : vector<8x8xi32>
    %c0_19 = arith.constant 0 : index
    %c0_20 = arith.constant 0 : index
    %39 = vector.load %arg2[%c0_19, %c0_20] : memref<8x1xi32, #tpu.memory_space<vmem>>, vector<8x1xi32>
    %40 = vector.broadcast %39 : vector<8x1xi32> to vector<8x8xi32>
    %41 = arith.cmpi eq, %38, %40 : vector<8x8xi32>
    %42 = arith.extui %41 : vector<8x8xi1> to vector<8x8xi32>
    %43 = arith.sitofp %42 : vector<8x8xi32> to vector<8x8xf32>
    %44 = arith.mulf %43, %34 : vector<8x8xf32>
    %cst_21 = arith.constant dense<0.000000e+00> : vector<8xf32>
    %45 = vector.multi_reduction <add>, %44, %cst_21 [1] : vector<8x8xf32> to vector<8xf32>
    %46 = vector.shape_cast %45 : vector<8xf32> to vector<8x1xf32>
    %47 = arith.mulf %37, %34 : vector<8x8xf32>
    %cst_22 = arith.constant dense<0.000000e+00> : vector<8xf32>
    %48 = vector.multi_reduction <add>, %47, %cst_22 [1] : vector<8x8xf32> to vector<8xf32>
    %49 = vector.shape_cast %48 : vector<8xf32> to vector<8x1xf32>
    %cst_23 = arith.constant 0.000000e+00 : f32
    %50 = vector.broadcast %cst_23 : f32 to vector<8x1xf32>
    %51 = arith.subf %50, %49 : vector<8x1xf32>
    %52 = tpu.iota {dimensions = array<i32: 1>} : vector<8x128xi32>
    %c0_i32 = arith.constant 0 : i32
    %53 = vector.broadcast %c0_i32 : i32 to vector<8x128xi32>
    %54 = arith.cmpi eq, %52, %53 : vector<8x128xi32>
    %cst_24 = arith.constant 0.000000e+00 : f32
    %55 = vector.shape_cast %46 : vector<8x1xf32> to vector<8x1xf32>
    %56 = vector.broadcast %55 : vector<8x1xf32> to vector<8x128xf32>
    %57 = vector.broadcast %cst_24 : f32 to vector<8x128xf32>
    %58 = arith.select %54, %56, %57 : vector<8x128xi1>, vector<8x128xf32>
    %c1_i32 = arith.constant 1 : i32
    %59 = vector.broadcast %c1_i32 : i32 to vector<8x128xi32>
    %60 = arith.cmpi eq, %52, %59 : vector<8x128xi32>
    %cst_25 = arith.constant 0.000000e+00 : f32
    %61 = vector.shape_cast %24 : vector<8x1xf32> to vector<8x1xf32>
    %62 = vector.broadcast %61 : vector<8x1xf32> to vector<8x128xf32>
    %63 = vector.broadcast %cst_25 : f32 to vector<8x128xf32>
    %64 = arith.select %60, %62, %63 : vector<8x128xi1>, vector<8x128xf32>
    %65 = arith.addf %58, %64 : vector<8x128xf32>
    %c2_i32 = arith.constant 2 : i32
    %66 = vector.broadcast %c2_i32 : i32 to vector<8x128xi32>
    %67 = arith.cmpi eq, %52, %66 : vector<8x128xi32>
    %cst_26 = arith.constant 0.000000e+00 : f32
    %68 = vector.shape_cast %51 : vector<8x1xf32> to vector<8x1xf32>
    %69 = vector.broadcast %68 : vector<8x1xf32> to vector<8x128xf32>
    %70 = vector.broadcast %cst_26 : f32 to vector<8x128xf32>
    %71 = arith.select %67, %69, %70 : vector<8x128xi1>, vector<8x128xf32>
    %72 = arith.addf %65, %71 : vector<8x128xf32>
    %c0_27 = arith.constant 0 : index
    %c0_28 = arith.constant 0 : index
    %73 = vector.load %arg9[%c0_27, %c0_28] : memref<8x128xf32, #tpu.memory_space<vmem>>, vector<8x128xf32>
    tpu.vector_store %arg9[%c0_27, %c0_28], %72 {strides = array<i32>} : memref<8x128xf32, #tpu.memory_space<vmem>>, vector<8x128xf32>,
    return
  }
  func.func @transform_0(%arg0: i32) -> (i32, i32) {
    %c0_i32 = arith.constant 0 : i32
    %c0_i32_0 = arith.constant 0 : i32
    return %arg0, %c0_i32 : i32, i32
  }
  func.func @transform_1(%arg0: i32) -> (i32, i32) {
    %c0_i32 = arith.constant 0 : i32
    %c0_i32_0 = arith.constant 0 : i32
    return %arg0, %c0_i32 : i32, i32
  }
  func.func @transform_2(%arg0: i32) -> (i32, i32) {
    %c0_i32 = arith.constant 0 : i32
    %c0_i32_0 = arith.constant 0 : i32
    %c0_i32_1 = arith.constant 0 : i32
    return %c0_i32, %c0_i32_0 : i32, i32
  }
  func.func @transform_3(%arg0: i32) -> (i32, i32) {
    %c0_i32 = arith.constant 0 : i32
    %c0_i32_0 = arith.constant 0 : i32
    %c0_i32_1 = arith.constant 0 : i32
    return %c0_i32, %c0_i32_0 : i32, i32
  }
  func.func @transform_4(%arg0: i32) -> (i32, i32) {
    %c0_i32 = arith.constant 0 : i32
    %c0_i32_0 = arith.constant 0 : i32
    %c0_i32_1 = arith.constant 0 : i32
    return %c0_i32, %c0_i32_0 : i32, i32
  }
  func.func @transform_5(%arg0: i32) -> (i32, i32) {
    %c0_i32 = arith.constant 0 : i32
    %c0_i32_0 = arith.constant 0 : i32
    %c0_i32_1 = arith.constant 0 : i32
    return %c0_i32, %c0_i32_0 : i32, i32
  }
  func.func @transform_6(%arg0: i32) -> (i32, i32) {
    %c0_i32 = arith.constant 0 : i32
    %c0_i32_0 = arith.constant 0 : i32
    %c0_i32_1 = arith.constant 0 : i32
    return %c0_i32, %c0_i32_0 : i32, i32
  }
  func.func @transform_7(%arg0: i32) -> (i32, i32) {
    %c0_i32 = arith.constant 0 : i32
    %c0_i32_0 = arith.constant 0 : i32
    %c0_i32_1 = arith.constant 0 : i32
    return %c0_i32, %c0_i32_0 : i32, i32
  }
  func.func @transform_8(%arg0: i32) -> (i32, i32) {
    %c0_i32 = arith.constant 0 : i32
    %c0_i32_0 = arith.constant 0 : i32
    return %arg0, %c0_i32 : i32, i32
  }
}

</mosaic_0001>

<bundles_post_ra>
// kernel: tpu_custom_call.1
= control target key start
LH: loop header
LB: loop body
LE: loop exit
PB: predicated region body
PF: predicated region fallthrough
CT: control target
= control target key end

     0   :  { %13 = vsyncpa [#allocation3], 0  ;;  %s2346_s0 = inlined_call_operand.vmem [shape: f32[8,32], index: 0, kind: input, shape index: {}]   ;;  %s2347_s1 = inlined_call_operand.vmem [shape: s32[8,1], index: 1, kind: input, shape index: {}]   ;;  %s2348_s2 = inlined_call_operand.hbm [shape: bf16[32,512], index: 2, kind: input, shape index: {}]   ;;  %s2349_s3 = inlined_call_operand.vmem [shape: f32[1,512], index: 3, kind: input, shape index: {}]   ;;  %s2350_s4 = inlined_call_operand.hbm [shape: bf16[512,512], index: 4, kind: input, shape index: {}]   ;;  %s2351_s5 = inlined_call_operand.vmem [shape: f32[1,512], index: 5, kind: input, shape index: {}]   ;;  %s2352_s6 = inlined_call_operand.hbm [shape: bf16[512,128], index: 6, kind: input, shape index: {}]   ;;  %s2353_s7 = inlined_call_operand.vmem [shape: f32[1,128], index: 7, kind: input, shape index: {}]   ;;  %s2354_s8 = inlined_call_operand.hbm [shape: f32[8,128], index: 8, kind: output, shape index: {}]  }
   0x1   :  { %14 = vsyncpa [#allocation6], 0 }
   0x2   :  { %15 = vsyncpa [#allocation4], 0  ;;  %s2183_s27 = smov [#allocation5]   ;;  %s2184_s29 = smov [#allocation2]  }
   0x3   :  { %s39_s28 = sshll.u32 %s2183_s27, 4  ;;  %s25_s30 = sshll.u32 %s2184_s29, 4  ;;  %s40_s28 = int_to_ptr.vmem [resolvable:$true] %s39_s28  ;;  %s2239_s30 = int_to_ptr.vmem [resolvable:$true] %s25_s30 }
   0x4   :  { %s2089_s11 = scalar_lea.hbm %s2350_s4, 16384 }
   0x5   :  { %p2090_p0 = scmp.ne.s32.totalorder %s2350_s4, %s2089_s11  ;;  %p2093_p1 = scmp.lt.u32.totalorder %s2089_s11, %s2350_s4 }
   0x7   :  { %p2095_p2 = pnand %p2093_p1, %p2090_p0 }
   0x9   :  { %2098 = shalt.err (!%p2095_p2)
}
   0xa   :  { %s2099_s16 = scalar_lea.vmem %s40_s28, 16384  ;;  %p2104_p4 = scmp.lt.s32.totalorder %s40_s28, %s40_s28 }
   0xb   :  { %p2100_p3 = scmp.ne.s32.totalorder %s40_s28, %s2099_s16  ;;  %p2105_p5 = scmp.lt.s32.totalorder %s2099_s16, %s2099_s16 }
   0xd   :  { %p2106_p6 = por %p2105_p5, %p2104_p4 }
   0xf   :  { %p2107_p7 = pnand %p2106_p6, %p2100_p3 }
  0x11   :  { %2110 = shalt.err (!%p2107_p7)
}
  0x12   :  { %s2185_s17 = smov 256   ;;  %s2186_s18 = smov 16  }
  0x13   :  { %45 = dma.hbm_to_vmem [thread:$0]  %s2350_s4, 16384, %s40_s28, [#allocation6], %s2185_s17, %s2185_s17, %s2186_s18  }
  0x14   :  { %s2111_s23 = scalar_lea.hbm %s2348_s2, 1024 }
  0x15   :  { %p2112_p8 = scmp.ne.s32.totalorder %s2348_s2, %s2111_s23  ;;  %p2115_p9 = scmp.lt.u32.totalorder %s2111_s23, %s2348_s2 }
  0x17   :  { %p2117_p10 = pnand %p2115_p9, %p2112_p8 }
  0x19   :  { %2120 = shalt.err (!%p2117_p10)
}
  0x1a   :  { %s2121_s29 = scalar_lea.vmem %s2239_s30, 1024  ;;  %p2126_p12 = scmp.lt.s32.totalorder %s2239_s30, %s2239_s30 }
  0x1b   :  { %p2122_p11 = scmp.ne.s32.totalorder %s2239_s30, %s2121_s29  ;;  %p2127_p13 = scmp.lt.s32.totalorder %s2121_s29, %s2121_s29 }
  0x1d   :  { %p2128_p0 = por %p2127_p13, %p2126_p12 }
  0x1f   :  { %p2129_p1 = pnand %p2128_p0, %p2122_p11 }
  0x21   :  { %2132 = shalt.err (!%p2129_p1)
}
  0x22   :  { %31 = dma.hbm_to_vmem [thread:$0]  %s2348_s2, 1024, %s2239_s30, [#allocation3], %s2185_s17, %s2185_s17, %s2186_s18  }
  0x23   :  { %s2187_s9 = smov [#allocation7]   ;;  %s2133_s13 = scalar_lea.hbm %s2352_s6, 4096 }
  0x24   :  { %s53_s10 = sshll.u32 %s2187_s9, 4  ;;  %p2134_p2 = scmp.ne.s32.totalorder %s2352_s6, %s2133_s13  ;;  %s54_s10 = int_to_ptr.vmem [resolvable:$true] %s53_s10 }
  0x25   :  { %p2137_p3 = scmp.lt.u32.totalorder %s2133_s13, %s2352_s6 }
  0x27   :  { %p2139_p4 = pnand %p2137_p3, %p2134_p2 }
  0x29   :  { %2142 = shalt.err (!%p2139_p4)
}
  0x2a   :  { %s2143_s20 = scalar_lea.vmem %s54_s10, 4096  ;;  %p2148_p6 = scmp.lt.s32.totalorder %s54_s10, %s54_s10 }
  0x2b   :  { %p2144_p5 = scmp.ne.s32.totalorder %s54_s10, %s2143_s20  ;;  %p2149_p7 = scmp.lt.s32.totalorder %s2143_s20, %s2143_s20 }
  0x2d   :  { %p2150_p8 = por %p2149_p7, %p2148_p6 }
  0x2f   :  { %p2151_p9 = pnand %p2150_p8, %p2144_p5 }
  0x31   :  { %2154 = shalt.err (!%p2151_p9)
}
  0x32   :  { %s2188_s2 = smov 64   ;;  %s2189_s30 = smov 4  }
  0x33   :  { %59 = dma.hbm_to_vmem [thread:$0]  %s2352_s6, 4096, %s54_s10, [#allocation6], %s2188_s2, %s2188_s2, %s2189_s30  }
  0x34   :  { %2177 = dma.done.wait [#allocation3], 1024  }
  0x35   :  { %2178 = vsyncadd [#allocation3], 4294966272 }
  0x36   :  { %2179 = dma.done.wait [#allocation6], 20480  }
  0x37   :  { %2180 = vsyncadd [#allocation6], 4294946816  ;;  %v2190_v0 = vmov 0   ;;  %v1847_v1 = vld [vmem:[#allocation2 + $0x4] ss:$16 sps:$4 sm:$0xff]   ;;  %vm144_vm0 = vcmask 261120  }
  0x38   :  { %180 = vmatprep.mubr.bf16.mxu0 %v2190_v0  ;;  %221 = vmatprep.mubr.bf16.mxu1 %v2190_v0  ;;  %v1849_v2 = vld [vmem:[#allocation2] ss:$16 sps:$4 sm:$0xff]   ;;  %v1850_v3 = vld [vmem:[#allocation2 + $0x24] ss:$16 sps:$4 sm:$0xff]   ;;  %v1853_v6 = vld [vmem:[#allocation2 + $0xc] ss:$16 sps:$4 sm:$0xff]  }
  0x39   :  { %1845 = vset.pattern.permute.xlu1 %v2190_v0  ;;  %148 = vmatprep.subr.bf16.mxu0 %v1847_v1  ;;  %v1852_v4 = vld [vmem:[#allocation2 + $0x20] ss:$16 sps:$4 sm:$0xff]   ;;  %v1855_v7 = vld [vmem:[#allocation2 + $0x8] ss:$16 sps:$4 sm:$0xff]   ;;  %v1856_v8 = vld [vmem:[#allocation2 + $0x2c] ss:$16 sps:$4 sm:$0xff]  }
  0x3a   :  { %v72_v5 = vld [vmem:[%s2346_s0] sm:$0xff]  ;;  %149 = vmatpush1.bf16.msra.mxu0 %v1849_v2  ;;  %189 = vmatprep.subr.bf16.mxu1 %v1853_v6  ;;  %v1858_v10 = vld [vmem:[#allocation2 + $0x28] ss:$16 sps:$4 sm:$0xff]   ;;  %v1864_v13 = vld [vmem:[#allocation5 + $0xc] ss:$16 sps:$4 sm:$0xff]   ;;  %vm1543_vm1 = vcmask 64512  }
  0x3b   :  { %150 = vmatprep.subr.bf16.mxu0 %v1850_v3  ;;  %v73_v9 = vpack.c.bf16 %v72_v5, %v72_v5  ;;  %190 = vmatpush1.bf16.msra.mxu1 %v1855_v7  ;;  %v1861_v11 = vld [vmem:[#allocation5 + $0x4] ss:$16 sps:$4 sm:$0xff]   ;;  %v1859_v12 = vld [vmem:[#allocation5] ss:$16 sps:$4 sm:$0xff]   ;;  %v1862_v15 = vld [vmem:[#allocation5 + $0x8] ss:$16 sps:$4 sm:$0xff]  }
  0x3c   :  { %191 = vmatprep.subr.bf16.mxu1 %v1856_v8  ;;  %v1867_v14 = vld [vmem:[#allocation5 + $0x24] ss:$16 sps:$4 sm:$0xff]   ;;  %v1865_v16 = vld [vmem:[#allocation5 + $0x20] ss:$16 sps:$4 sm:$0xff]   ;;  %v1870_v17 = vld [vmem:[#allocation5 + $0x2c] ss:$16 sps:$4 sm:$0xff]  }
  0x3d   :  { %v1873_v18 = vld [vmem:[#allocation5 + $0x44] ss:$16 sps:$4 sm:$0xff]   ;;  %v1868_v19 = vld [vmem:[#allocation5 + $0x28] ss:$16 sps:$4 sm:$0xff]   ;;  %v1871_v20 = vld [vmem:[#allocation5 + $0x40] ss:$16 sps:$4 sm:$0xff]  }
  0x3e   :  { %151 = vmatpush1.bf16.msra.mxu0 %v1852_v4  ;;  %v1876_v21 = vld [vmem:[#allocation5 + $0x4c] ss:$16 sps:$4 sm:$0xff]   ;;  %v1879_v22 = vld [vmem:[#allocation5 + $0x64] ss:$16 sps:$4 sm:$0xff]   ;;  %v1874_v23 = vld [vmem:[#allocation5 + $0x48] ss:$16 sps:$4 sm:$0xff]  }
  0x3f   :  { %1028 = vmatprep.subr.bf16.mxu0 %v1861_v11  ;;  %192 = vmatpush1.bf16.msra.mxu1 %v1858_v10  ;;  %v1877_v24 = vld [vmem:[#allocation5 + $0x60] ss:$16 sps:$4 sm:$0xff]   ;;  %v1882_v25 = vld [vmem:[#allocation5 + $0x6c] ss:$16 sps:$4 sm:$0xff]   ;;  %v1885_v26 = vld [vmem:[#allocation5 + $0x84] ss:$16 sps:$4 sm:$0xff]  }
  0x40   :  { %1110 = vmatprep.subr.bf16.mxu1 %v1864_v13  ;;  %v1880_v27 = vld [vmem:[#allocation5 + $0x68] ss:$16 sps:$4 sm:$0xff]   ;;  %v1883_v28 = vld [vmem:[#allocation5 + $0x80] ss:$16 sps:$4 sm:$0xff]   ;;  %v1888_v29 = vld [vmem:[#allocation5 + $0x8c] ss:$16 sps:$4 sm:$0xff]   ;;  %v84_v13 = vlaneseq }
  0x41   :  { %1614 = vmatmul.mubr.msk.bf16.vlgmr.msra.gmra.mrb[0].mxu0 %vm144_vm0, %v73_v9  ;;  %v1891_v30 = vld [vmem:[#allocation5 + $0xa4] ss:$16 sps:$4 sm:$0xff]   ;;  %v1886_v31 = vld [vmem:[#allocation5 + $0x88] ss:$16 sps:$4 sm:$0xff]   ;;  %v1889_v32 = vld [vmem:[#allocation5 + $0xa0] ss:$16 sps:$4 sm:$0xff]  }
  0x42   :  { %1029 = vmatpush1.bf16.msra.mxu0 %v1859_v12  ;;  %1615 = vmatmul.mubr.msk.bf16.vlgmr.msra.gmra.mrb[0].mxu1 %vm144_vm0, %v73_v9  ;;  %v1894_v33 = vld [vmem:[#allocation5 + $0xac] ss:$16 sps:$4 sm:$0xff]   ;;  %v1897_v34 = vld [vmem:[#allocation5 + $0xc4] ss:$16 sps:$4 sm:$0xff]   ;;  %v1892_v35 = vld [vmem:[#allocation5 + $0xa8] ss:$16 sps:$4 sm:$0xff]  }
  0x43   :  { %1030 = vmatprep.subr.bf16.mxu0 %v1867_v14  ;;  %1111 = vmatpush1.bf16.msra.mxu1 %v1862_v15  ;;  %v1895_v36 = vld [vmem:[#allocation5 + $0xc0] ss:$16 sps:$4 sm:$0xff]   ;;  %v1900_v37 = vld [vmem:[#allocation5 + $0xcc] ss:$16 sps:$4 sm:$0xff]   ;;  %v1903_v38 = vld [vmem:[#allocation5 + $0xe4] ss:$16 sps:$4 sm:$0xff]  }
  0x44   :  { %1112 = vmatprep.subr.bf16.mxu1 %v1870_v17  ;;  %v1898_v39 = vld [vmem:[#allocation5 + $0xc8] ss:$16 sps:$4 sm:$0xff]   ;;  %v1901_v40 = vld [vmem:[#allocation5 + $0xe0] ss:$16 sps:$4 sm:$0xff]   ;;  %v1906_v41 = vld [vmem:[#allocation5 + $0xec] ss:$16 sps:$4 sm:$0xff]  }
  0x45   :  { %v1909_v42 = vld [vmem:[#allocation5 + $0x104] ss:$16 sps:$4 sm:$0xff]   ;;  %v1904_v43 = vld [vmem:[#allocation5 + $0xe8] ss:$16 sps:$4 sm:$0xff]   ;;  %v1907_v44 = vld [vmem:[#allocation5 + $0x100] ss:$16 sps:$4 sm:$0xff]  }
  0x46   :  { %1031 = vmatpush1.bf16.msra.mxu0 %v1865_v16  ;;  %v1912_v45 = vld [vmem:[#allocation5 + $0x10c] ss:$16 sps:$4 sm:$0xff]   ;;  %v1915_v46 = vld [vmem:[#allocation5 + $0x124] ss:$16 sps:$4 sm:$0xff]   ;;  %v1910_v47 = vld [vmem:[#allocation5 + $0x108] ss:$16 sps:$4 sm:$0xff]  }
  0x47   :  { %1032 = vmatprep.subr.bf16.mxu0 %v1873_v18  ;;  %1113 = vmatpush1.bf16.msra.mxu1 %v1868_v19  ;;  %v1913_v48 = vld [vmem:[#allocation5 + $0x120] ss:$16 sps:$4 sm:$0xff]   ;;  %v1918_v49 = vld [vmem:[#allocation5 + $0x12c] ss:$16 sps:$4 sm:$0xff]   ;;  %v1921_v50 = vld [vmem:[#allocation5 + $0x144] ss:$16 sps:$4 sm:$0xff]  }
  0x48   :  { %1114 = vmatprep.subr.bf16.mxu1 %v1876_v21  ;;  %v1916_v51 = vld [vmem:[#allocation5 + $0x128] ss:$16 sps:$4 sm:$0xff]   ;;  %v1919_v52 = vld [vmem:[#allocation5 + $0x140] ss:$16 sps:$4 sm:$0xff]   ;;  %v1924_v53 = vld [vmem:[#allocation5 + $0x14c] ss:$16 sps:$4 sm:$0xff]  }
  0x49   :  { %v1927_v54 = vld [vmem:[#allocation5 + $0x164] ss:$16 sps:$4 sm:$0xff]   ;;  %v1922_v55 = vld [vmem:[#allocation5 + $0x148] ss:$16 sps:$4 sm:$0xff]   ;;  %v1925_v56 = vld [vmem:[#allocation5 + $0x160] ss:$16 sps:$4 sm:$0xff]  }
  0x4a   :  { %1033 = vmatpush1.bf16.msra.mxu0 %v1871_v20  ;;  %v1930_v57 = vld [vmem:[#allocation5 + $0x16c] ss:$16 sps:$4 sm:$0xff]   ;;  %v1933_v58 = vld [vmem:[#allocation5 + $0x184] ss:$16 sps:$4 sm:$0xff]   ;;  %v1928_v59 = vld [vmem:[#allocation5 + $0x168] ss:$16 sps:$4 sm:$0xff]  }
  0x4b   :  { %1034 = vmatprep.subr.bf16.mxu0 %v1879_v22  ;;  %1115 = vmatpush1.bf16.msra.mxu1 %v1874_v23  ;;  %v1931_v60 = vld [vmem:[#allocation5 + $0x180] ss:$16 sps:$4 sm:$0xff]   ;;  %v1936_v61 = vld [vmem:[#allocation5 + $0x18c] ss:$16 sps:$4 sm:$0xff]   ;;  %v1939_v62 = vld [vmem:[#allocation5 + $0x1a4] ss:$16 sps:$4 sm:$0xff]  }
  0x4c   :  { %1116 = vmatprep.subr.bf16.mxu1 %v1882_v25  ;;  %v1934_v63 = vld [vmem:[#allocation5 + $0x188] ss:$16 sps:$4 sm:$0xff]   ;;  %v1937_v0 = vld [vmem:[#allocation5 + $0x1a0] ss:$16 sps:$4 sm:$0xff]   ;;  %v1942_v1 = vld [vmem:[#allocation5 + $0x1ac] ss:$16 sps:$4 sm:$0xff]  }
  0x4d   :  { %v1940_v2 = vld [vmem:[#allocation5 + $0x1a8] ss:$16 sps:$4 sm:$0xff]   ;;  %v1945_v3 = vld [vmem:[#allocation5 + $0x1c4] ss:$16 sps:$4 sm:$0xff]   ;;  %v1948_v4 = vld [vmem:[#allocation5 + $0x1cc] ss:$16 sps:$4 sm:$0xff]  }
  0x4e   :  { %1035 = vmatpush1.bf16.msra.mxu0 %v1877_v24  ;;  %v1943_v5 = vld [vmem:[#allocation5 + $0x1c0] ss:$16 sps:$4 sm:$0xff]   ;;  %v1946_v6 = vld [vmem:[#allocation5 + $0x1c8] ss:$16 sps:$4 sm:$0xff]   ;;  %v1951_v7 = vld [vmem:[#allocation5 + $0x1e4] ss:$16 sps:$4 sm:$0xff]  }
  0x4f   :  { %1036 = vmatprep.subr.bf16.mxu0 %v1885_v26  ;;  %1117 = vmatpush1.bf16.msra.mxu1 %v1880_v27  ;;  %v1954_v8 = vld [vmem:[#allocation5 + $0x1ec] ss:$16 sps:$4 sm:$0xff]   ;;  %v1949_v9 = vld [vmem:[#allocation5 + $0x1e0] ss:$16 sps:$4 sm:$0xff]   ;;  %v1952_v10 = vld [vmem:[#allocation5 + $0x1e8] ss:$16 sps:$4 sm:$0xff]  }
  0x50   :  { %1118 = vmatprep.subr.bf16.mxu1 %v1888_v29  ;;  %v1957_v11 = vld [vmem:[#allocation5 + $0x204] ss:$16 sps:$4 sm:$0xff]   ;;  %v1960_v12 = vld [vmem:[#allocation5 + $0x20c] ss:$16 sps:$4 sm:$0xff]   ;;  %v2286_v14 = vshrl.u32 %v84_v13, 7 }
  0x51   :  { %v2292_v16 = vld [vmem:[%s2349_s3] sm:$0xf] }
  0x52   :  { %1037 = vmatpush1.bf16.msra.mxu0 %v1883_v28  ;;  %v86_v15 = vsub.s32 0, %v2286_v14  ;;  %v90_v17 = vsub.s32 1, %v2286_v14  ;;  %v98_v19 = vsub.s32 3, %v2286_v14 }
  0x53   :  { %1038 = vmatprep.subr.bf16.mxu0 %v1891_v30  ;;  %1119 = vmatpush1.bf16.msra.mxu1 %v1886_v31 }
  0x54   :  { %1120 = vmatprep.subr.bf16.mxu1 %v1894_v33  ;;  %v87_v18 = vrot.slane %v2292_v16, %v86_v15  ;;  %v91_v20 = vrot.slane %v2292_v16, %v90_v17  ;;  %v99_v24 = vrot.slane %v2292_v16, %v98_v19 }
  0x56   :  { %1039 = vmatpush1.bf16.msra.mxu0 %v1889_v32 }
  0x57   :  { %1040 = vmatprep.subr.bf16.mxu0 %v1897_v34  ;;  %1121 = vmatpush1.bf16.msra.mxu1 %v1892_v35  ;;  %v1955_v35 = vld [vmem:[#allocation5 + $0x200] ss:$16 sps:$4 sm:$0xff]  }
  0x58   :  { %1122 = vmatprep.subr.bf16.mxu1 %v1900_v37 }
  0x5a   :  { %1041 = vmatpush1.bf16.msra.mxu0 %v1895_v36  ;;  %v1958_v36 = vld [vmem:[#allocation5 + $0x208] ss:$16 sps:$4 sm:$0xff]  }
  0x5b   :  { %1042 = vmatprep.subr.bf16.mxu0 %v1903_v38  ;;  %1123 = vmatpush1.bf16.msra.mxu1 %v1898_v39  ;;  %v1963_v39 = vld [vmem:[#allocation5 + $0x224] ss:$16 sps:$4 sm:$0xff]  }
  0x5c   :  { %1124 = vmatprep.subr.bf16.mxu1 %v1906_v41 }
  0x5e   :  { %1043 = vmatpush1.bf16.msra.mxu0 %v1901_v40  ;;  %v1966_v40 = vld [vmem:[#allocation5 + $0x22c] ss:$16 sps:$4 sm:$0xff]  }
  0x5f   :  { %1044 = vmatprep.subr.bf16.mxu0 %v1909_v42  ;;  %1125 = vmatpush1.bf16.msra.mxu1 %v1904_v43  ;;  %v1961_v43 = vld [vmem:[#allocation5 + $0x220] ss:$16 sps:$4 sm:$0xff]  }
  0x60   :  { %1126 = vmatprep.subr.bf16.mxu1 %v1912_v45  ;;  %v1969_v45 = vld [vmem:[#allocation5 + $0x244] ss:$16 sps:$4 sm:$0xff]  }
  0x62   :  { %1045 = vmatpush1.bf16.msra.mxu0 %v1907_v44  ;;  %v1964_v44 = vld [vmem:[#allocation5 + $0x228] ss:$16 sps:$4 sm:$0xff]  }
  0x63   :  { %1046 = vmatprep.subr.bf16.mxu0 %v1915_v46  ;;  %1127 = vmatpush1.bf16.msra.mxu1 %v1910_v47  ;;  %v1972_v46 = vld [vmem:[#allocation5 + $0x24c] ss:$16 sps:$4 sm:$0xff]   ;;  %v1967_v47 = vld [vmem:[#allocation5 + $0x240] ss:$16 sps:$4 sm:$0xff]  }
  0x64   :  { %1128 = vmatprep.subr.bf16.mxu1 %v1918_v49  ;;  %v1975_v49 = vld [vmem:[#allocation5 + $0x264] ss:$16 sps:$4 sm:$0xff]  }
  0x66   :  { %1047 = vmatpush1.bf16.msra.mxu0 %v1913_v48  ;;  %v1970_v48 = vld [vmem:[#allocation5 + $0x248] ss:$16 sps:$4 sm:$0xff]  }
  0x67   :  { %1048 = vmatprep.subr.bf16.mxu0 %v1921_v50  ;;  %1129 = vmatpush1.bf16.msra.mxu1 %v1916_v51  ;;  %v1978_v50 = vld [vmem:[#allocation5 + $0x26c] ss:$16 sps:$4 sm:$0xff]   ;;  %v1973_v51 = vld [vmem:[#allocation5 + $0x260] ss:$16 sps:$4 sm:$0xff]  }
  0x68   :  { %1130 = vmatprep.subr.bf16.mxu1 %v1924_v53  ;;  %v1981_v53 = vld [vmem:[#allocation5 + $0x284] ss:$16 sps:$4 sm:$0xff]  }
  0x6a   :  { %1049 = vmatpush1.bf16.msra.mxu0 %v1919_v52  ;;  %v1976_v52 = vld [vmem:[#allocation5 + $0x268] ss:$16 sps:$4 sm:$0xff]  }
  0x6b   :  { %1050 = vmatprep.subr.bf16.mxu0 %v1927_v54  ;;  %1131 = vmatpush1.bf16.msra.mxu1 %v1922_v55  ;;  %v1984_v54 = vld [vmem:[#allocation5 + $0x28c] ss:$16 sps:$4 sm:$0xff]   ;;  %v1979_v55 = vld [vmem:[#allocation5 + $0x280] ss:$16 sps:$4 sm:$0xff]  }
  0x6c   :  { %1132 = vmatprep.subr.bf16.mxu1 %v1930_v57  ;;  %v1987_v57 = vld [vmem:[#allocation5 + $0x2a4] ss:$16 sps:$4 sm:$0xff]  }
  0x6e   :  { %1051 = vmatpush1.bf16.msra.mxu0 %v1925_v56  ;;  %v1982_v56 = vld [vmem:[#allocation5 + $0x288] ss:$16 sps:$4 sm:$0xff]  }
  0x6f   :  { %1052 = vmatprep.subr.bf16.mxu0 %v1933_v58  ;;  %1133 = vmatpush1.bf16.msra.mxu1 %v1928_v59  ;;  %v1990_v58 = vld [vmem:[#allocation5 + $0x2ac] ss:$16 sps:$4 sm:$0xff]   ;;  %v1985_v59 = vld [vmem:[#allocation5 + $0x2a0] ss:$16 sps:$4 sm:$0xff]  }
  0x70   :  { %1134 = vmatprep.subr.bf16.mxu1 %v1936_v61  ;;  %v1993_v61 = vld [vmem:[#allocation5 + $0x2c4] ss:$16 sps:$4 sm:$0xff]  }
  0x72   :  { %1053 = vmatpush1.bf16.msra.mxu0 %v1931_v60  ;;  %v1988_v60 = vld [vmem:[#allocation5 + $0x2a8] ss:$16 sps:$4 sm:$0xff]  }
  0x73   :  { %1054 = vmatprep.subr.bf16.mxu0 %v1939_v62  ;;  %1135 = vmatpush1.bf16.msra.mxu1 %v1934_v63  ;;  %v1996_v62 = vld [vmem:[#allocation5 + $0x2cc] ss:$16 sps:$4 sm:$0xff]   ;;  %v1991_v63 = vld [vmem:[#allocation5 + $0x2c0] ss:$16 sps:$4 sm:$0xff]  }
  0x74   :  { %1136 = vmatprep.subr.bf16.mxu1 %v1942_v1  ;;  %v1999_v1 = vld [vmem:[#allocation5 + $0x2e4] ss:$16 sps:$4 sm:$0xff]  }
  0x76   :  { %1055 = vmatpush1.bf16.msra.mxu0 %v1937_v0  ;;  %v1994_v0 = vld [vmem:[#allocation5 + $0x2c8] ss:$16 sps:$4 sm:$0xff]  }
  0x77   :  { %1137 = vmatpush1.bf16.msra.mxu1 %v1940_v2  ;;  %1056 = vmatprep.subr.bf16.mxu0 %v1945_v3  ;;  %v2002_v2 = vld [vmem:[#allocation5 + $0x2ec] ss:$16 sps:$4 sm:$0xff]   ;;  %v1997_v3 = vld [vmem:[#allocation5 + $0x2e0] ss:$16 sps:$4 sm:$0xff]  }
  0x78   :  { %1138 = vmatprep.subr.bf16.mxu1 %v1948_v4  ;;  %v2000_v4 = vld [vmem:[#allocation5 + $0x2e8] ss:$16 sps:$4 sm:$0xff]  }
  0x7a   :  { %1057 = vmatpush1.bf16.msra.mxu0 %v1943_v5  ;;  %v2005_v5 = vld [vmem:[#allocation5 + $0x304] ss:$16 sps:$4 sm:$0xff]  }
  0x7b   :  { %1139 = vmatpush1.bf16.msra.mxu1 %v1946_v6  ;;  %1058 = vmatprep.subr.bf16.mxu0 %v1951_v7  ;;  %v2008_v6 = vld [vmem:[#allocation5 + $0x30c] ss:$16 sps:$4 sm:$0xff]   ;;  %v2003_v7 = vld [vmem:[#allocation5 + $0x300] ss:$16 sps:$4 sm:$0xff]  }
  0x7c   :  { %1140 = vmatprep.subr.bf16.mxu1 %v1954_v8  ;;  %v2006_v8 = vld [vmem:[#allocation5 + $0x308] ss:$16 sps:$4 sm:$0xff]  }
  0x7e   :  { %1059 = vmatpush1.bf16.msra.mxu0 %v1949_v9  ;;  %v2011_v9 = vld [vmem:[#allocation5 + $0x324] ss:$16 sps:$4 sm:$0xff]  }
  0x7f   :  { %1141 = vmatpush1.bf16.msra.mxu1 %v1952_v10  ;;  %1069 = vmatprep.subr.bf16.mxu0 %v1957_v11  ;;  %v2014_v10 = vld [vmem:[#allocation5 + $0x32c] ss:$16 sps:$4 sm:$0xff]   ;;  %v2009_v11 = vld [vmem:[#allocation5 + $0x320] ss:$16 sps:$4 sm:$0xff]  }
  0x80   :  { %1151 = vmatprep.subr.bf16.mxu1 %v1960_v12  ;;  %v2012_v12 = vld [vmem:[#allocation5 + $0x328] ss:$16 sps:$4 sm:$0xff]  }
 0x114   :  { %v182_v21 = vpop.f32.mrb[0].mxu0 }
 0x115   :  { %v183_v22 = vadd.f32 %v182_v21, %v87_v18  ;;  %v184_v23 = vpop.f32.mrb[1].mxu0  ;;  %v2305_v29 = vpop.f32.mrb[0].mxu1  ;;  %v2017_v18 = vld [vmem:[#allocation5 + $0x344] ss:$16 sps:$4 sm:$0xff]   ;;  %v2015_v21 = vld [vmem:[#allocation5 + $0x340] ss:$16 sps:$4 sm:$0xff]  }
 0x116   :  { %v185_v25 = vadd.f32 %v184_v23, %v91_v20  ;;  %v186_v26 = vpop.f32.mrb[2].mxu0  ;;  %v225_v31 = vpop.f32.mrb[1].mxu1  ;;  %v2020_v20 = vld [vmem:[#allocation5 + $0x34c] ss:$16 sps:$4 sm:$0xff]   ;;  %v2023_v23 = vld [vmem:[#allocation5 + $0x364] ss:$16 sps:$4 sm:$0xff]  }
 0x117   :  { %v230_v27 = vmax.f32 %v183_v22, 0.0  ;;  %v187_v28 = vpop.f32.mrb[3].mxu0  ;;  %v226_v32 = vadd.f32 %v225_v31, %v99_v24  ;;  %v227_v33 = vpop.f32.mrb[2].mxu1  ;;  %v2018_v22 = vld [vmem:[#allocation5 + $0x348] ss:$16 sps:$4 sm:$0xff]  }
 0x118   :  { %v231_v30 = vmax.f32 %v185_v25, 0.0  ;;  %v228_v37 = vpop.f32.mrb[3].mxu1  ;;  %v2026_v24 = vld [vmem:[#allocation5 + $0x36c] ss:$16 sps:$4 sm:$0xff]   ;;  %v2021_v25 = vld [vmem:[#allocation5 + $0x360] ss:$16 sps:$4 sm:$0xff]  }
 0x119   :  { %v234_v38 = vpack.c.bf16 %v230_v27, %v230_v27  ;;  %v233_v41 = vmax.f32 %v226_v32, 0.0  ;;  %v2024_v26 = vld [vmem:[#allocation5 + $0x368] ss:$16 sps:$4 sm:$0xff]   ;;  %v2029_v27 = vld [vmem:[#allocation5 + $0x384] ss:$16 sps:$4 sm:$0xff]   ;;  %v94_v32 = vsub.s32 2, %v2286_v14 }
 0x11a   :  { %v235_v34 = vpack.c.bf16 %v231_v30, %v231_v30  ;;  %v2032_v28 = vld [vmem:[#allocation5 + $0x38c] ss:$16 sps:$4 sm:$0xff]   ;;  %v2027_v30 = vld [vmem:[#allocation5 + $0x380] ss:$16 sps:$4 sm:$0xff]   ;;  %v2030_v31 = vld [vmem:[#allocation5 + $0x388] ss:$16 sps:$4 sm:$0xff]  }
 0x11b   :  { %v237_v42 = vpack.c.bf16 %v233_v41, %v233_v41  ;;  %v2035_v33 = vld [vmem:[#allocation5 + $0x3a4] ss:$16 sps:$4 sm:$0xff]   ;;  %v95_v37 = vrot.slane %v2292_v16, %v94_v32  ;;  %v2042_v41 = vld [vmem:[#allocation5 + $0x3c8] ss:$16 sps:$4 sm:$0xff]  }
 0x11c   :  { %1060 = vmatprep.mubr.bf16.mxu0 %v235_v34  ;;  %1142 = vmatprep.mubr.bf16.mxu1 %v235_v34  ;;  %v2038_v34 = vld [vmem:[#allocation5 + $0x3ac] ss:$16 sps:$4 sm:$0xff]   ;;  %v2051_v16 = vld [vmem:[#allocation7 + $0x40] sm:$0xff]  }
 0x11d   :  { %1061 = vmatmul.mubr.bf16.vlgmr.msra.gmra.mrb[4].mxu0 %v234_v38  ;;  %1143 = vmatmul.mubr.bf16.vlgmr.msra.gmra.mrb[4].mxu1 %v234_v38  ;;  %v2041_v38 = vld [vmem:[#allocation5 + $0x3c4] ss:$16 sps:$4 sm:$0xff]  }
 0x11e   :  { %1070 = vmatpush1.bf16.msra.mxu0 %v1955_v35  ;;  %1152 = vmatpush1.bf16.msra.mxu1 %v1958_v36  ;;  %v2033_v35 = vld [vmem:[#allocation5 + $0x3a0] ss:$16 sps:$4 sm:$0xff]   ;;  %v2036_v36 = vld [vmem:[#allocation5 + $0x3a8] ss:$16 sps:$4 sm:$0xff]  }
 0x11f   :  { %1071 = vmatprep.subr.bf16.mxu0 %v1963_v39  ;;  %1153 = vmatprep.subr.bf16.mxu1 %v1966_v40  ;;  %v2044_v39 = vld [vmem:[#allocation5 + $0x3cc] ss:$16 sps:$4 sm:$0xff]   ;;  %v2039_v40 = vld [vmem:[#allocation5 + $0x3c0] ss:$16 sps:$4 sm:$0xff]  }
 0x120   :  { %1101 = vmatprep.mubr.bf16.mxu0 %v237_v42  ;;  %1183 = vmatprep.mubr.bf16.mxu1 %v237_v42  ;;  %v224_v42 = vadd.f32 %v2305_v29, %v95_v37  ;;  %v2055_v29 = vld [vmem:[#allocation7 + $0x48] sm:$0xff]  }
 0x122   :  { %1072 = vmatpush1.bf16.msra.mxu0 %v1961_v43  ;;  %1154 = vmatpush1.bf16.msra.mxu1 %v1964_v44  ;;  %v2047_v43 = vld [vmem:[#allocation5 + $0x3e4] ss:$16 sps:$4 sm:$0xff]   ;;  %v2050_v44 = vld [vmem:[#allocation5 + $0x3ec] ss:$16 sps:$4 sm:$0xff]  }
 0x123   :  { %1073 = vmatprep.subr.bf16.mxu0 %v1969_v45  ;;  %1155 = vmatprep.subr.bf16.mxu1 %v1972_v46  ;;  %v2045_v45 = vld [vmem:[#allocation5 + $0x3e0] ss:$16 sps:$4 sm:$0xff]   ;;  %v2048_v46 = vld [vmem:[#allocation5 + $0x3e8] ss:$16 sps:$4 sm:$0xff]  }
 0x126   :  { %1074 = vmatpush1.bf16.msra.mxu0 %v1967_v47  ;;  %1156 = vmatpush1.bf16.msra.mxu1 %v1970_v48  ;;  %v232_v47 = vmax.f32 %v224_v42, 0.0  ;;  %v2052_v48 = vld [vmem:[#allocation7 + $0xc0] sm:$0xff]  }
 0x127   :  { %1075 = vmatprep.subr.bf16.mxu0 %v1975_v49  ;;  %1157 = vmatprep.subr.bf16.mxu1 %v1978_v50  ;;  %v2053_v49 = vld [vmem:[#allocation7] sm:$0xff]  }
 0x128   :  { %v2054_v50 = vld [vmem:[#allocation7 + $0x80] sm:$0xff]  }
 0x12a   :  { %1076 = vmatpush1.bf16.msra.mxu0 %v1973_v51  ;;  %1158 = vmatpush1.bf16.msra.mxu1 %v1976_v52  ;;  %v236_v51 = vpack.c.bf16 %v232_v47, %v232_v47  ;;  %v2056_v52 = vld [vmem:[#allocation7 + $0xc8] sm:$0xff]  }
 0x12b   :  { %1077 = vmatprep.subr.bf16.mxu0 %v1981_v53  ;;  %1159 = vmatprep.subr.bf16.mxu1 %v1984_v54  ;;  %v2057_v53 = vld [vmem:[#allocation7 + $0x8] sm:$0xff]  }
 0x12c   :  { %v2058_v54 = vld [vmem:[#allocation7 + $0x88] sm:$0xff]  }
 0x12e   :  { %1078 = vmatpush1.bf16.msra.mxu0 %v1979_v55  ;;  %1160 = vmatpush1.bf16.msra.mxu1 %v1982_v56  ;;  %v2059_v55 = vld [vmem:[#allocation7 + $0x50] sm:$0xff]  }
 0x12f   :  { %1079 = vmatprep.subr.bf16.mxu0 %v1987_v57  ;;  %1161 = vmatprep.subr.bf16.mxu1 %v1990_v58  ;;  %v2060_v56 = vld [vmem:[#allocation7 + $0xd0] sm:$0xff]  }
 0x130   :  { %v2061_v57 = vld [vmem:[#allocation7 + $0x10] sm:$0xff]  }
 0x131   :  { %v2062_v58 = vld [vmem:[#allocation7 + $0x90] sm:$0xff]  }
 0x132   :  { %1080 = vmatpush1.bf16.msra.mxu0 %v1985_v59  ;;  %1162 = vmatpush1.bf16.msra.mxu1 %v1988_v60  ;;  %v2063_v59 = vld [vmem:[#allocation7 + $0x58] sm:$0xff]  }
 0x133   :  { %1081 = vmatprep.subr.bf16.mxu0 %v1993_v61  ;;  %1163 = vmatprep.subr.bf16.mxu1 %v1996_v62  ;;  %v2064_v60 = vld [vmem:[#allocation7 + $0xd8] sm:$0xff]  }
 0x134   :  { %v2065_v61 = vld [vmem:[#allocation7 + $0x18] sm:$0xff]  }
 0x135   :  { %v2066_v62 = vld [vmem:[#allocation7 + $0x98] sm:$0xff]  }
 0x136   :  { %1082 = vmatpush1.bf16.msra.mxu0 %v1991_v63  ;;  %1164 = vmatpush1.bf16.msra.mxu1 %v1994_v0  ;;  %v2067_v63 = vld [vmem:[#allocation7 + $0x60] sm:$0xff]  }
 0x137   :  { %1083 = vmatprep.subr.bf16.mxu0 %v1999_v1  ;;  %1165 = vmatprep.subr.bf16.mxu1 %v2002_v2  ;;  %v2068_v0 = vld [vmem:[#allocation7 + $0xe0] sm:$0xff]  }
 0x138   :  { %v2069_v1 = vld [vmem:[#allocation7 + $0x20] sm:$0xff]  }
 0x139   :  { %v2070_v2 = vld [vmem:[#allocation7 + $0xa0] sm:$0xff]  }
 0x13a   :  { %1084 = vmatpush1.bf16.msra.mxu0 %v1997_v3  ;;  %1166 = vmatpush1.bf16.msra.mxu1 %v2000_v4  ;;  %v2071_v3 = vld [vmem:[#allocation7 + $0x68] sm:$0xff]  }
 0x13b   :  { %1085 = vmatprep.subr.bf16.mxu0 %v2005_v5  ;;  %1167 = vmatprep.subr.bf16.mxu1 %v2008_v6  ;;  %v2072_v4 = vld [vmem:[#allocation7 + $0xe8] sm:$0xff]  }
 0x13c   :  { %v2073_v5 = vld [vmem:[#allocation7 + $0x28] sm:$0xff]  }
 0x13d   :  { %v2074_v6 = vld [vmem:[#allocation7 + $0xa8] sm:$0xff]  }
 0x13e   :  { %1086 = vmatpush1.bf16.msra.mxu0 %v2003_v7  ;;  %1168 = vmatpush1.bf16.msra.mxu1 %v2006_v8  ;;  %v2075_v7 = vld [vmem:[#allocation7 + $0x70] sm:$0xff]  }
 0x13f   :  { %1087 = vmatprep.subr.bf16.mxu0 %v2011_v9  ;;  %1169 = vmatprep.subr.bf16.mxu1 %v2014_v10  ;;  %v2076_v8 = vld [vmem:[#allocation7 + $0xf0] sm:$0xff]  }
 0x140   :  { %v2077_v9 = vld [vmem:[#allocation7 + $0x30] sm:$0xff]  }
 0x141   :  { %v2078_v10 = vld [vmem:[#allocation7 + $0xb0] sm:$0xff]  }
 0x142   :  { %1088 = vmatpush1.bf16.msra.mxu0 %v2009_v11  ;;  %1170 = vmatpush1.bf16.msra.mxu1 %v2012_v12  ;;  %v2079_v11 = vld [vmem:[#allocation7 + $0x78] sm:$0xff]  }
 0x143   :  { %1089 = vmatprep.subr.bf16.mxu0 %v2017_v18  ;;  %1171 = vmatprep.subr.bf16.mxu1 %v2020_v20  ;;  %v2080_v12 = vld [vmem:[#allocation7 + $0xf8] sm:$0xff]  }
 0x144   :  { %v2081_v18 = vld [vmem:[#allocation7 + $0x38] sm:$0xff]  }
 0x145   :  { %v2082_v20 = vld [vmem:[#allocation7 + $0xb8] sm:$0xff]  }
 0x146   :  { %1090 = vmatpush1.bf16.msra.mxu0 %v2015_v21  ;;  %1172 = vmatpush1.bf16.msra.mxu1 %v2018_v22  ;;  %v366_v21 = vld [vmem:[%s2351_s5] sm:$0xf] }
 0x147   :  { %1091 = vmatprep.subr.bf16.mxu0 %v2023_v23  ;;  %1173 = vmatprep.subr.bf16.mxu1 %v2026_v24  ;;  %v371_v22 = vrot.slane %v366_v21, %v86_v15  ;;  %v379_v23 = vrot.slane %v366_v21, %v94_v32  ;;  %v375_v24 = vrot.slane %v366_v21, %v90_v17 }
 0x14a   :  { %1092 = vmatpush1.bf16.msra.mxu0 %v2021_v25  ;;  %1174 = vmatpush1.bf16.msra.mxu1 %v2024_v26  ;;  %v383_v25 = vrot.slane %v366_v21, %v98_v19 }
 0x14b   :  { %1093 = vmatprep.subr.bf16.mxu0 %v2029_v27  ;;  %1175 = vmatprep.subr.bf16.mxu1 %v2032_v28 }
 0x14e   :  { %1094 = vmatpush1.bf16.msra.mxu0 %v2027_v30  ;;  %1176 = vmatpush1.bf16.msra.mxu1 %v2030_v31 }
 0x14f   :  { %1095 = vmatprep.subr.bf16.mxu0 %v2035_v33  ;;  %1177 = vmatprep.subr.bf16.mxu1 %v2038_v34 }
 0x152   :  { %1096 = vmatpush1.bf16.msra.mxu0 %v2033_v35  ;;  %1178 = vmatpush1.bf16.msra.mxu1 %v2036_v36 }
 0x153   :  { %1097 = vmatprep.subr.bf16.mxu0 %v2041_v38  ;;  %1179 = vmatprep.subr.bf16.mxu1 %v2044_v39 }
 0x156   :  { %1098 = vmatpush1.bf16.msra.mxu0 %v2039_v40  ;;  %1180 = vmatpush1.bf16.msra.mxu1 %v2042_v41 }
 0x157   :  { %1099 = vmatprep.subr.bf16.mxu0 %v2047_v43  ;;  %1181 = vmatprep.subr.bf16.mxu1 %v2050_v44 }
 0x15a   :  { %1100 = vmatpush1.bf16.msra.mxu0 %v2045_v45  ;;  %1182 = vmatpush1.bf16.msra.mxu1 %v2048_v46  ;;  %v1744_v45 = vld [vmem:[%s2353_s7] ss:$0 sm:$0xff] }
 0x15b   :  { %1778 = vmatprep.subr.bf16.mxu0 %v2051_v16  ;;  %1800 = vmatprep.subr.bf16.mxu1 %v2052_v48 }
 0x15d   :  { %1102 = vmatmul.mubr.bf16.vlgmr.msra.gmra.mrb[4].mxu0 %v236_v51  ;;  %1184 = vmatmul.mubr.bf16.vlgmr.msra.gmra.mrb[4].mxu1 %v236_v51 }
 0x15e   :  { %1779 = vmatpush3.bf16.msra.mxu0 %v2053_v49  ;;  %1801 = vmatpush3.bf16.msra.mxu1 %v2054_v50 }
 0x15f   :  { %1780 = vmatprep.subr.bf16.mxu0 %v2055_v29  ;;  %1802 = vmatprep.subr.bf16.mxu1 %v2056_v52 }
 0x162   :  { %1781 = vmatpush3.bf16.msra.mxu0 %v2057_v53  ;;  %1803 = vmatpush3.bf16.msra.mxu1 %v2058_v54 }
 0x163   :  { %1782 = vmatprep.subr.bf16.mxu0 %v2059_v55  ;;  %1804 = vmatprep.subr.bf16.mxu1 %v2060_v56  ;;  %v1560_v55 = vld [vmem:[%s2347_s1] sm:$0xff]  ;;  %s2193_s1 = smov [#allocation8]  }
 0x164   :  { %1562 = vperm.xlu1 %1845, %v1560_v55   ;;  %s1596_s7 = sshll.u32 %s2193_s1, 4  ;;  %s1597_s7 = int_to_ptr.vmem [resolvable:$true] %s1596_s7 }
 0x165   :  { %s2155_s27 = scalar_lea.vmem %s1597_s7, 128  ;;  %p2160_p11 = scmp.lt.s32.totalorder %s1597_s7, %s1597_s7 }
 0x166   :  { %1783 = vmatpush3.bf16.msra.mxu0 %v2061_v57  ;;  %1805 = vmatpush3.bf16.msra.mxu1 %v2062_v58  ;;  %p2156_p10 = scmp.ne.s32.totalorder %s1597_s7, %s2155_s27  ;;  %p2161_p12 = scmp.lt.s32.totalorder %s2155_s27, %s2155_s27 }
 0x167   :  { %1784 = vmatprep.subr.bf16.mxu0 %v2063_v59  ;;  %1806 = vmatprep.subr.bf16.mxu1 %v2064_v60 }
 0x168   :  { %p2162_p13 = por %p2161_p12, %p2160_p11 }
 0x16a   :  { %1785 = vmatpush3.bf16.msra.mxu0 %v2065_v61  ;;  %1807 = vmatpush3.bf16.msra.mxu1 %v2066_v62  ;;  %v2191_v61 = vmov 8   ;;  %p2163_p0 = pnand %p2162_p13, %p2156_p10 }
 0x16b   :  { %1786 = vmatprep.subr.bf16.mxu0 %v2067_v63  ;;  %1808 = vmatprep.subr.bf16.mxu1 %v2068_v0  ;;  %v1559_v63 = vand.u32 127, %v84_v13 }
 0x16c   :  { %1846 = vset.pattern.permute.xlu0 %v2191_v61 }
 0x16d   :  { %vm1576_vm3 = vcmp.eq.s32.totalorder %v1559_v63, 0  ;;  %vm1578_vm4 = vcmp.eq.s32.totalorder %v1559_v63, 1  ;;  %vm1586_vm5 = vcmp.eq.s32.totalorder %v1559_v63, 2 }
 0x16e   :  { %1787 = vmatpush3.bf16.msra.mxu0 %v2069_v1  ;;  %1809 = vmatpush3.bf16.msra.mxu1 %v2070_v2 }
 0x16f   :  { %1788 = vmatprep.subr.bf16.mxu0 %v2071_v3  ;;  %1810 = vmatprep.subr.bf16.mxu1 %v2072_v4  ;;  %v2192_v4 = vmov 0.0  }
 0x172   :  { %1789 = vmatpush3.bf16.msra.mxu0 %v2073_v5  ;;  %1811 = vmatpush3.bf16.msra.mxu1 %v2074_v6 }
 0x173   :  { %1790 = vmatprep.subr.bf16.mxu0 %v2075_v7  ;;  %1812 = vmatprep.subr.bf16.mxu1 %v2076_v8 }
 0x176   :  { %1791 = vmatpush3.bf16.msra.mxu0 %v2077_v9  ;;  %1813 = vmatpush3.bf16.msra.mxu1 %v2078_v10 }
 0x177   :  { %1792 = vmatprep.subr.bf16.mxu0 %v2079_v11  ;;  %1814 = vmatprep.subr.bf16.mxu1 %v2080_v12 }
 0x17a   :  { %1793 = vmatpush3.bf16.msra.mxu0 %v2081_v18  ;;  %1815 = vmatpush3.bf16.msra.mxu1 %v2082_v20 }
 0x1e3   :  { %v1563_v0 = vpop.permute.xlu1 %1562 }
 0x1e4   :  { %vm1564_vm2 = vcmp.eq.s32.totalorder %v1559_v63, %v1563_v0 }
 0x1e5   :  { %v1777_v5 = vsel %vm1564_vm2, 1.0, %v2192_v4 }
 0x230   :  { %v1103_v26 = vpop.f32.mrb[4].mxu0  ;;  %v1185_v27 = vpop.f32.mrb[4].mxu1 }
 0x231   :  { %v1822_v28 = vadd.f32 %v1103_v26, %v371_v22  ;;  %v1824_v30 = vadd.f32 %v1185_v27, %v379_v23  ;;  %v1105_v31 = vpop.f32.mrb[5].mxu0  ;;  %v1187_v33 = vpop.f32.mrb[5].mxu1 }
 0x232   :  { %v1823_v34 = vadd.f32 %v1105_v31, %v375_v24  ;;  %v1825_v35 = vadd.f32 %v1187_v33, %v383_v25  ;;  %v1107_v36 = vpop.f32.mrb[6].mxu0  ;;  %v1189_v37 = vpop.f32.mrb[6].mxu1 }
 0x233   :  { %v1192_v15 = vmax.f32 %v1822_v28, 0.0  ;;  %v1194_v38 = vmax.f32 %v1824_v30, 0.0  ;;  %v1108_v39 = vpop.f32.mrb[7].mxu0  ;;  %v1190_v32 = vpop.f32.mrb[7].mxu1 }
 0x234   :  { %v1193_v40 = vmax.f32 %v1823_v34, 0.0  ;;  %v1195_v41 = vmax.f32 %v1825_v35, 0.0 }
 0x235   :  { %v1196_v14 = vpack.c.bf16 %v1192_v15, %v1192_v15  ;;  %v1198_v19 = vpack.c.bf16 %v1194_v38, %v1194_v38 }
 0x236   :  { %v1197_v17 = vpack.c.bf16 %v1193_v40, %v1193_v40  ;;  %v1199_v42 = vpack.c.bf16 %v1195_v41, %v1195_v41 }
 0x238   :  { %1495 = vmatprep.mubr.bf16.mxu0 %v1197_v17  ;;  %1535 = vmatprep.mubr.bf16.mxu1 %v1199_v42 }
 0x239   :  { %1496 = vmatmul.mubr.bf16.vlgmr.msra.gmra.mrb[8].mxu0 %v1196_v14  ;;  %1536 = vmatmul.mubr.bf16.vlgmr.msra.gmra.mrb[8].mxu1 %v1198_v19 }
 0x30c   :  { %v1794_v43 = vpop.f32.mrb[8].mxu0  ;;  %v1816_v44 = vpop.f32.mrb[8].mxu1 }
 0x30d   :  { %v1795_v46 = vpop.f32.mrb[9].mxu0  ;;  %v1817_v47 = vpop.f32.mrb[9].mxu1 }
 0x30e   :  { %v1796_v16 = vadd.f32 %v1795_v46, %v1794_v43  ;;  %v1818_v48 = vadd.f32 %v1817_v47, %v1816_v44  ;;  %v1797_v49 = vpop.f32.mrb[10].mxu0  ;;  %v1819_v50 = vpop.f32.mrb[10].mxu1 }
 0x30f   :  { %v1798_v51 = vpop.f32.mrb[11].mxu0  ;;  %v1820_v29 = vpop.f32.mrb[11].mxu1 }
 0x310   :  { %v1498_v52 = vadd.f32 %v1796_v16, %v1744_v45 }
 0x312   :  { %v1538_v53 = vadd.f32 %v1818_v48, %v1498_v52 }
 0x314   :  { %v1544_v54 = vsel %vm1543_vm1, %v1538_v53, -inf }
 0x315   :  { %1545 = vmax.xlane.f32.xlu0 %v1544_v54 }
 0x3a2   :  { %v1546_v56 = vpop.xlane.xlu0 %1545 }
 0x3a3   :  { %v1547_v57 = vsub.f32 %v1538_v53, %v1546_v56 }
 0x3a5   :  { %v1548_v58 = vmul.f32 1.442695, %v1547_v57 }
 0x3a7   :  { %2083 = vpow2.f32 %v1548_v58 }
 0x3b1   :  { %v2084_v59 = vpop.eup %2083 }
 0x3b2   :  { %v1550_v60 = vsel %vm1543_vm1, %v2084_v59, 0.0 }
 0x3b3   :  { %1551 = vadd.xlane.f32.xlu0 %v1550_v60 }
 0x440   :  { %v1552_v62 = vpop.xlane.xlu0 %1551 }
 0x441   :  { %2085 = vlog2.f32 %v1552_v62 }
 0x442   :  { %2087 = vrcp.f32 %v1552_v62 }
 0x44b   :  { %v2086_v1 = vpop.eup %2085 }
 0x44c   :  { %v2088_v2 = vpop.eup %2087  ;;  %v1554_v3 = vmul.f32 0.6931472, %v2086_v1 }
 0x44d   :  { %v1557_v7 = vmul.f32 %v2088_v2, %v2084_v59 }
 0x44e   :  { %v1555_v6 = vsub.f32 %v1547_v57, %v1554_v3 }
 0x450   :  { %v1571_v8 = vmul.f32 %v1557_v7, %v1555_v6  ;;  %v1567_v9 = vmul.f32 %v1777_v5, %v1555_v6 }
 0x452   :  { %v1572_v10 = vsel %vm1543_vm1, %v1571_v8, 0.0  ;;  %v1568_v11 = vsel %vm1543_vm1, %v1567_v9, 0.0 }
 0x453   :  { %1573 = vadd.xlane.f32.xlu0 %v1572_v10  ;;  %1569 = vadd.xlane.f32.xlu1 %v1568_v11 }
 0x469   :  { %1581 = vperm.xlu0 %1846, %v1538_v53  }
 0x4e0   :  { %v1574_v12 = vpop.xlane.xlu0 %1573  ;;  %v1570_v13 = vpop.xlane.xlu1 %1569 }
 0x4e1   :  { %v1575_v18 = vsub.f32 0.0, %v1574_v12  ;;  %v1577_v21 = vsel %vm1576_vm3, %v1570_v13, 0.0 }
 0x4e3   :  { %v1587_v24 = vsel %vm1586_vm5, %v1575_v18, 0.0 }
 0x4e8   :  { %v1582_v20 = vpop.permute.xlu0 %1581 }
 0x4e9   :  { %v1584_v22 = vsel %vm1578_vm4, %v1582_v20, 0.0 }
 0x4ea   :  { %v1585_v23 = vadd.f32 %v1584_v22, %v1577_v21 }
 0x4ec   :  { %v1588_v25 = vadd.f32 %v1587_v24, %v1585_v23 }
 0x4ee   :  { %1589 = vst [vmem:[#allocation8] sm:$0xff] %v1588_v25 }
 0x4ef   :  { %2166 = shalt.err (!%p2163_p0)
}
 0x4f0   :  { %s2167_s28 = scalar_lea.hbm %s2354_s8, 128 }
 0x4f1   :  { %p2168_p1 = scmp.ne.s32.totalorder %s2354_s8, %s2167_s28  ;;  %p2171_p2 = scmp.lt.u32.totalorder %s2167_s28, %s2354_s8 }
 0x4f3   :  { %p2173_p3 = pnand %p2171_p2, %p2168_p1 }
 0x4f5   :  { %2176 = shalt.err (!%p2173_p3)
}
 0x4f6   :  { %1599 = dma.vmem_to_hbm [thread:$0]  %s1597_s7, 128, %s2354_s8, [#allocation4]  }
 0x4f7   :  { %2181 = dma.done.wait [#allocation4], 128  }
 0x4f8   :  { %2182 = vsyncadd [#allocation4], 4294967168 }
 0x4f9   :  { %1603 = vsyncpa [#allocation3], 1 }
 0x4fa   :  { %1604 = vsyncpa [#allocation6], 1 }
 0x4fb   :  { %1605 = vsyncpa [#allocation4], 1 }

</bundles_post_ra>
